<compile_context>
chip_gen: v7x
topology: tpu7x:2x2x1
jax: 0.10.0
libtpu: 0.0.40
codegen_flags: <defaults>
</compile_context>

<pallas_src>
import functools

import jax
import jax.numpy as jnp
from jax.experimental import pallas as pl
from jax.experimental.pallas import tpu as pltpu

SUBLANE = 8  # f32 sublane count; output width is padded to this (not 128)


def _round_up(n, m):
    return ((n + m - 1) // m) * m


# --------------------------------------------------------------------------
# Kernel
# --------------------------------------------------------------------------
def central_value_kernel(x_ref, w1_ref, b1_ref, w2_ref, b2_ref, w3_ref, b3_ref,
                         o_ref):
    # fc1 + ReLU  (bf16 MXU inputs, f32 accumulation, f32 elementwise)
    x = x_ref[...].astype(jnp.bfloat16)
    h1 = jnp.dot(x, w1_ref[...], preferred_element_type=jnp.float32)
    h1 = jnp.maximum(h1 + b1_ref[...], 0.0)
    # fc2 + ReLU
    h2 = jnp.dot(h1.astype(jnp.bfloat16), w2_ref[...],
                 preferred_element_type=jnp.float32)
    h2 = jnp.maximum(h2 + b2_ref[...], 0.0)
    # fc3 (no activation) — narrow 8-wide output (team_size columns are valid)
    out = jnp.dot(h2.astype(jnp.bfloat16), w3_ref[...],
                  preferred_element_type=jnp.float32)
    o_ref[...] = (out + b3_ref[...]).astype(o_ref.dtype)


# --------------------------------------------------------------------------
# One-time parameter preparation (hoisted out of the per-call path)
# --------------------------------------------------------------------------
def prepare_params(params):
    """Cast matmul weights to bf16 and pad the final layer to an 8-wide output.

    Returns (prepared_weights, team_size); call once, reuse across forwards.
    """
    w1, b1, w2, b2, w3, b3 = params
    hidden = w1.shape[1]
    team_size = w3.shape[1]
    out_pad = _round_up(team_size, SUBLANE)

    w3p = jnp.zeros((hidden, out_pad), jnp.bfloat16).at[:, :team_size].set(
        w3.astype(jnp.bfloat16))
    b3p = jnp.zeros((1, out_pad), jnp.float32).at[:, :team_size].set(
        b3.astype(jnp.float32).reshape(1, -1))

    weights = (
        w1.astype(jnp.bfloat16), b1.astype(jnp.float32).reshape(1, -1),
        w2.astype(jnp.bfloat16), b2.astype(jnp.float32).reshape(1, -1),
        w3p, b3p,
    )
    return weights, team_size


# --------------------------------------------------------------------------
# Chip-aware tiling
# --------------------------------------------------------------------------
def _tile_cap_and_vmem_limit():
    """Pick the batch-tile cap and VMEM limit per chip generation."""
    try:
        vmem = pltpu.get_tpu_info().vmem_capacity_bytes
    except Exception:
        vmem = 64 << 20  # conservative (v7x-class) fallback
    if vmem <= (80 << 20):          # v7x: 64 MiB physical VMEM per TC
        return 4096, 32 << 20       # ~17 MB est. working set -> fits
    return 8192, 64 << 20           # v5e/v6e: 128 MiB physical VMEM


def _pick_tile_b(B, cap):
    """Tile B tightly (avoid near-2x padding for unlucky B), sublane-rounded."""
    if B <= cap:
        return _round_up(B, SUBLANE)
    n_tiles = -(-B // cap)                      # ceil(B / cap)
    return _round_up(-(-B // n_tiles), SUBLANE)  # ceil(B / n_tiles) -> tight tb


# --------------------------------------------------------------------------
# Forward
# --------------------------------------------------------------------------
@functools.partial(jax.jit,
                   static_argnames=("tile_b", "team_size", "vmem_limit"))
def _forward(x, w1b, b1f, w2b, b2f, w3p, b3p, *, tile_b, team_size, vmem_limit):
    B, in_dim = x.shape
    hidden = w1b.shape[1]
    out_pad = w3p.shape[1]

    Bp = _round_up(B, tile_b)
    if Bp != B:
        x = jnp.pad(x, ((0, Bp - B), (0, 0)))
    grid = (Bp // tile_b,)

    def resident(a):
        return pl.BlockSpec(a.shape, lambda i: (0,) * a.ndim)

    cost = pl.CostEstimate(
        flops=2 * Bp * (in_dim * hidden + hidden * hidden + hidden * out_pad),
        transcendentals=0,
        bytes_accessed=(Bp * in_dim * 4
                        + w1b.size * 2 + w2b.size * 2 + w3p.size * 2
                        + b1f.size * 4 + b2f.size * 4 + b3p.size * 4
                        + Bp * out_pad * 4),
    )

    out_padded = pl.pallas_call(
        central_value_kernel,
        out_shape=jax.ShapeDtypeStruct((Bp, out_pad), jnp.float32),
        grid_spec=pltpu.PrefetchScalarGridSpec(
            num_scalar_prefetch=0,
            grid=grid,
            in_specs=[
                pl.BlockSpec((tile_b, in_dim), lambda i: (i, 0)),  # x streams
                resident(w1b), resident(b1f),
                resident(w2b), resident(b2f),
                resident(w3p), resident(b3p),
            ],
            out_specs=pl.BlockSpec((tile_b, out_pad), lambda i: (i, 0)),
        ),
        compiler_params=pltpu.CompilerParams(
            # TODO(synk): if an xprof trace on v7x shows only one TensorCore
            # busy, switch this axis to pltpu.CORE_PARALLEL.
            dimension_semantics=("parallel",),
            vmem_limit_bytes=vmem_limit,
        ),
        cost_estimate=cost,
    )(x, w1b, b1f, w2b, b2f, w3p, b3p)

    return out_padded[:B, :team_size]


def central_value_net(x, prepared):
    """x: (B, total_state_dim) float32 -> (B, team_size) float32."""
    weights, team_size = prepared
    cap, vmem_limit = _tile_cap_and_vmem_limit()
    tb = _pick_tile_b(x.shape[0], cap)
    return _forward(x, *weights, tile_b=tb, team_size=team_size,
                    vmem_limit=vmem_limit)


# --------------------------------------------------------------------------
# Reference / init
# --------------------------------------------------------------------------
def init_params(key, total_state_dim, hidden_dim, team_size):
    """Deterministic init matching the torch Linear shapes (stored transposed)."""
    ks = jax.random.split(key, 6)

    def uniform_like_torch(kw, kb, fan_in, fan_out):
        bound = 1.0 / jnp.sqrt(fan_in)
        w = jax.random.uniform(kw, (fan_in, fan_out), jnp.float32, -bound, bound)
        b = jax.random.uniform(kb, (1, fan_out), jnp.float32, -bound, bound)
        return w, b

    w1, b1 = uniform_like_torch(ks[0], ks[1], total_state_dim, hidden_dim)
    w2, b2 = uniform_like_torch(ks[2], ks[3], hidden_dim, hidden_dim)
    w3, b3 = uniform_like_torch(ks[4], ks[5], hidden_dim, team_size)
    return (w1, b1, w2, b2, w3, b3)


def reference_forward(x, params):
    w1, b1, w2, b2, w3, b3 = params
    h = jax.nn.relu(x @ w1 + b1)
    h = jax.nn.relu(h @ w2 + b2)
    return h @ w3 + b3


if __name__ == "__main__":
    hidden_dim = 64
    team_size = 2
    total_state_dim = 32   # joint (central) state dim for the 2-agent team
    batch = 8

    key = jax.random.PRNGKey(0)
    k_x, k_p = jax.random.split(key)

    x = jax.random.normal(k_x, (batch, total_state_dim), dtype=jnp.float32)
    params = init_params(k_p, total_state_dim, hidden_dim, team_size)

    prepared = prepare_params(params)        # one-time weight prep (hoisted)
    out = central_value_net(x, prepared)
    out = jax.block_until_ready(out)

    ref = reference_forward(x, params)
    assert out.shape == (batch, team_size)
    # bf16 MXU inputs with f32 accumulation vs f32 reference -> relaxed tolerance.
    assert jnp.allclose(out, ref, atol=2e-2, rtol=2e-2), \
        f"max abs err {jnp.max(jnp.abs(out - ref))}"

    print("KERNEL_OK")
</pallas_src>

<mosaic_0001>
module attributes {stable_mosaic.version = 11 : i64} {
  func.func @central_value_kernel(%arg0: i32, %arg1: memref<8x32xf32, #tpu.memory_space<vmem>>, %arg2: memref<32x64xbf16, #tpu.memory_space<vmem>>, %arg3: memref<1x64xf32, #tpu.memory_space<vmem>>, %arg4: memref<64x64xbf16, #tpu.memory_space<vmem>>, %arg5: memref<1x64xf32, #tpu.memory_space<vmem>>, %arg6: memref<64x8xbf16, #tpu.memory_space<vmem>>, %arg7: memref<1x8xf32, #tpu.memory_space<vmem>>, %arg8: memref<8x8xf32, #tpu.memory_space<vmem>>) attributes {dimension_semantics = [#tpu.dimension_semantics<parallel>], iteration_bounds = array<i64: 1>, scalar_prefetch = 0 : i64, scratch_operands = 0 : i64, tpu.core_type = #tpu.core_type<tc>, window_params = [{transform_indices = @transform_0, window_bounds = array<i64: 8, 32>}, {pipeline_mode = #tpu.pipeline_mode<synchronous>, transform_indices = @transform_1, window_bounds = array<i64: 32, 64>}, {pipeline_mode = #tpu.pipeline_mode<synchronous>, transform_indices = @transform_2, window_bounds = array<i64: 1, 64>}, {pipeline_mode = #tpu.pipeline_mode<synchronous>, transform_indices = @transform_3, window_bounds = array<i64: 64, 64>}, {pipeline_mode = #tpu.pipeline_mode<synchronous>, transform_indices = @transform_4, window_bounds = array<i64: 1, 64>}, {pipeline_mode = #tpu.pipeline_mode<synchronous>, transform_indices = @transform_5, window_bounds = array<i64: 64, 8>}, {pipeline_mode = #tpu.pipeline_mode<synchronous>, transform_indices = @transform_6, window_bounds = array<i64: 1, 8>}, {transform_indices = @transform_7, window_bounds = array<i64: 8, 8>}]} {
    %c0 = arith.constant 0 : index
    %c0_0 = arith.constant 0 : index
    %0 = vector.load %arg1[%c0, %c0_0] : memref<8x32xf32, #tpu.memory_space<vmem>>, vector<8x32xf32>
    %1 = arith.truncf %0 : vector<8x32xf32> to vector<8x32xbf16>
    %c0_1 = arith.constant 0 : index
    %c0_2 = arith.constant 0 : index
    %2 = vector.load %arg2[%c0_1, %c0_2] : memref<32x64xbf16, #tpu.memory_space<vmem>>, vector<32x64xbf16>
    %cst = arith.constant dense<0.000000e+00> : vector<8x64xf32>
    %3 = tpu.matmul %1, %2, %cst {dimension_numbers = #tpu.dot_dimension_numbers<[1], [0], [0], [1], [0, 0, 1, 1], [], []>} : vector<8x32xbf16>, vector<32x64xbf16>, vector<8x64xf32> -> vector<8x64xf32>
    %c0_3 = arith.constant 0 : index
    %c0_4 = arith.constant 0 : index
    %4 = vector.load %arg3[%c0_3, %c0_4] : memref<1x64xf32, #tpu.memory_space<vmem>>, vector<1x64xf32>
    %5 = vector.broadcast %4 : vector<1x64xf32> to vector<8x64xf32>
    %6 = arith.addf %3, %5 : vector<8x64xf32>
    %cst_5 = arith.constant 0.000000e+00 : f32
    %7 = vector.broadcast %cst_5 : f32 to vector<8x64xf32>
    %8 = arith.maximumf %6, %7 : vector<8x64xf32>
    %9 = arith.truncf %8 : vector<8x64xf32> to vector<8x64xbf16>
    %c0_6 = arith.constant 0 : index
    %c0_7 = arith.constant 0 : index
    %10 = vector.load %arg4[%c0_6, %c0_7] : memref<64x64xbf16, #tpu.memory_space<vmem>>, vector<64x64xbf16>
    %cst_8 = arith.constant dense<0.000000e+00> : vector<8x64xf32>
    %11 = tpu.matmul %9, %10, %cst_8 {dimension_numbers = #tpu.dot_dimension_numbers<[1], [0], [0], [1], [0, 0, 1, 1], [], []>} : vector<8x64xbf16>, vector<64x64xbf16>, vector<8x64xf32> -> vector<8x64xf32>
    %c0_9 = arith.constant 0 : index
    %c0_10 = arith.constant 0 : index
    %12 = vector.load %arg5[%c0_9, %c0_10] : memref<1x64xf32, #tpu.memory_space<vmem>>, vector<1x64xf32>
    %13 = vector.broadcast %12 : vector<1x64xf32> to vector<8x64xf32>
    %14 = arith.addf %11, %13 : vector<8x64xf32>
    %cst_11 = arith.constant 0.000000e+00 : f32
    %15 = vector.broadcast %cst_11 : f32 to vector<8x64xf32>
    %16 = arith.maximumf %14, %15 : vector<8x64xf32>
    %17 = arith.truncf %16 : vector<8x64xf32> to vector<8x64xbf16>
    %c0_12 = arith.constant 0 : index
    %c0_13 = arith.constant 0 : index
    %18 = vector.load %arg6[%c0_12, %c0_13] : memref<64x8xbf16, #tpu.memory_space<vmem>>, vector<64x8xbf16>
    %cst_14 = arith.constant dense<0.000000e+00> : vector<8x8xf32>
    %19 = tpu.matmul %17, %18, %cst_14 {dimension_numbers = #tpu.dot_dimension_numbers<[1], [0], [0], [1], [0, 0, 1, 1], [], []>} : vector<8x64xbf16>, vector<64x8xbf16>, vector<8x8xf32> -> vector<8x8xf32>
    %c0_15 = arith.constant 0 : index
    %c0_16 = arith.constant 0 : index
    %20 = vector.load %arg7[%c0_15, %c0_16] : memref<1x8xf32, #tpu.memory_space<vmem>>, vector<1x8xf32>
    %21 = vector.broadcast %20 : vector<1x8xf32> to vector<8x8xf32>
    %22 = arith.addf %19, %21 : vector<8x8xf32>
    %c0_17 = arith.constant 0 : index
    %c0_18 = arith.constant 0 : index
    %23 = vector.load %arg8[%c0_17, %c0_18] : memref<8x8xf32, #tpu.memory_space<vmem>>, vector<8x8xf32>
    tpu.vector_store %arg8[%c0_17, %c0_18], %22 {strides = array<i32>} : memref<8x8xf32, #tpu.memory_space<vmem>>, vector<8x8xf32>,
    return
  }
  func.func @transform_0(%arg0: i32) -> (i32, i32) {
    %c0_i32 = arith.constant 0 : i32
    %c0_i32_0 = arith.constant 0 : i32
    return %arg0, %c0_i32 : i32, i32
  }
  func.func @transform_1(%arg0: i32) -> (i32, i32) {
    %c0_i32 = arith.constant 0 : i32
    %c0_i32_0 = arith.constant 0 : i32
    %c0_i32_1 = arith.constant 0 : i32
    return %c0_i32, %c0_i32_0 : i32, i32
  }
  func.func @transform_2(%arg0: i32) -> (i32, i32) {
    %c0_i32 = arith.constant 0 : i32
    %c0_i32_0 = arith.constant 0 : i32
    %c0_i32_1 = arith.constant 0 : i32
    return %c0_i32, %c0_i32_0 : i32, i32
  }
  func.func @transform_3(%arg0: i32) -> (i32, i32) {
    %c0_i32 = arith.constant 0 : i32
    %c0_i32_0 = arith.constant 0 : i32
    %c0_i32_1 = arith.constant 0 : i32
    return %c0_i32, %c0_i32_0 : i32, i32
  }
  func.func @transform_4(%arg0: i32) -> (i32, i32) {
    %c0_i32 = arith.constant 0 : i32
    %c0_i32_0 = arith.constant 0 : i32
    %c0_i32_1 = arith.constant 0 : i32
    return %c0_i32, %c0_i32_0 : i32, i32
  }
  func.func @transform_5(%arg0: i32) -> (i32, i32) {
    %c0_i32 = arith.constant 0 : i32
    %c0_i32_0 = arith.constant 0 : i32
    %c0_i32_1 = arith.constant 0 : i32
    return %c0_i32, %c0_i32_0 : i32, i32
  }
  func.func @transform_6(%arg0: i32) -> (i32, i32) {
    %c0_i32 = arith.constant 0 : i32
    %c0_i32_0 = arith.constant 0 : i32
    %c0_i32_1 = arith.constant 0 : i32
    return %c0_i32, %c0_i32_0 : i32, i32
  }
  func.func @transform_7(%arg0: i32) -> (i32, i32) {
    %c0_i32 = arith.constant 0 : i32
    %c0_i32_0 = arith.constant 0 : i32
    return %arg0, %c0_i32 : i32, i32
  }
}

</mosaic_0001>

<bundles_post_ra>
// kernel: _forward.1
= control target key start
LH: loop header
LB: loop body
LE: loop exit
PB: predicated region body
PF: predicated region fallthrough
CT: control target
= control target key end

     0   :  { %12 = vsyncpa [#allocation3], 0  ;;  %s386_s24 = smov [#allocation2]   ;;  %s487_s0 = inlined_call_operand.vmem [shape: f32[8,32], index: 0, kind: input, shape index: {}]   ;;  %s488_s1 = inlined_call_operand.hbm [shape: bf16[32,64], index: 1, kind: input, shape index: {}]   ;;  %s489_s2 = inlined_call_operand.vmem [shape: f32[1,64], index: 2, kind: input, shape index: {}]   ;;  %s490_s3 = inlined_call_operand.vmem [shape: bf16[64,64], index: 3, kind: input, shape index: {}]   ;;  %s491_s4 = inlined_call_operand.vmem [shape: f32[1,64], index: 4, kind: input, shape index: {}]   ;;  %s492_s5 = inlined_call_operand.vmem [shape: bf16[64,8], index: 5, kind: input, shape index: {}]   ;;  %s493_s6 = inlined_call_operand.vmem [shape: f32[1,8], index: 6, kind: input, shape index: {}]   ;;  %s494_s7 = inlined_call_operand.vmem [shape: f32[8,8], index: 7, kind: output, shape index: {}]  }
   0x1   :  { %s20_s25 = sshll.u32 %s386_s24, 4  ;;  %s362_s28 = scalar_lea.hbm %s488_s1, 256  ;;  %s21_s25 = int_to_ptr.vmem [resolvable:$true] %s20_s25 }
   0x2   :  { %p363_p0 = scmp.ne.s32.totalorder %s488_s1, %s362_s28  ;;  %p366_p1 = scmp.lt.u32.totalorder %s362_s28, %s488_s1 }
   0x4   :  { %p368_p2 = pnand %p366_p1, %p363_p0 }
   0x6   :  { %371 = shalt.err (!%p368_p2)
}
   0x7   :  { %s372_s10 = scalar_lea.vmem %s21_s25, 256  ;;  %p377_p4 = scmp.lt.s32.totalorder %s21_s25, %s21_s25 }
   0x8   :  { %p373_p3 = scmp.ne.s32.totalorder %s21_s25, %s372_s10  ;;  %p378_p5 = scmp.lt.s32.totalorder %s372_s10, %s372_s10 }
   0xa   :  { %p379_p6 = por %p378_p5, %p377_p4 }
   0xc   :  { %p380_p7 = pnand %p379_p6, %p373_p3 }
   0xe   :  { %383 = shalt.err (!%p380_p7)
}
   0xf   :  { %s387_s11 = smov 64   ;;  %s388_s12 = smov 4  }
  0x10   :  { %26 = dma.hbm_to_vmem [thread:$0]  %s488_s1, 256, %s21_s25, [#allocation3], %s387_s11, %s387_s11, %s388_s12  }
  0x11   :  { %384 = dma.done.wait [#allocation3], 256  }
  0x12   :  { %385 = vsyncadd [#allocation3], 4294967040  ;;  %v389_v0 = vmov 0.0   ;;  %vm390_vm0 = vmmov 0   ;;  %v352_v1 = vld [vmem:[#allocation2] sm:$0xff]   ;;  %v353_v2 = vld [vmem:[#allocation2 + $0x8] sm:$0xff]  }
  0x13   :  { %315 = vmatprep.subr.bf16.mxu0 %v389_v0  ;;  %319 = vmatprep.mubr.msk.bf16.mxu0 %vm390_vm0, %v389_v0  ;;  %v41_v3 = vld [vmem:[%s487_s0] sm:$0xff]  ;;  %vm66_vm1 = vcmask 261120   ;;  %v355_v5 = vld [vmem:[%s490_s3 + $0x8] sm:$0xff]   ;;  %v356_v7 = vld [vmem:[%s490_s3 + $0x10] sm:$0xff]   ;;  %vm151_vm2 = vcmask 523264   ;;  %vm279_vm3 = vcmask 64512  }
  0x14   :  { %323 = vmatprep.subr.bf16.mxu1 %v389_v0  ;;  %331 = vmatprep.mubr.msk.bf16.mxu1 %vm390_vm0, %v389_v0  ;;  %v354_v4 = vld [vmem:[%s490_s3] sm:$0xff]   ;;  %v42_v6 = vpack.c.bf16 %v41_v3, %v41_v3  ;;  %v357_v8 = vld [vmem:[%s490_s3 + $0x18] sm:$0xff]   ;;  %v359_v10 = vld [vmem:[%s492_s5 + $0x8] sm:$0xff]  }
  0x15   :  { %316 = vmatpush3.bf16.msra.mxu0 %v352_v1  ;;  %324 = vmatpush3.bf16.msra.mxu1 %v354_v4  ;;  %v358_v9 = vld [vmem:[%s492_s5] sm:$0xff]   ;;  %v360_v19 = vld [vmem:[%s492_s5 + $0x10] sm:$0xff]   ;;  %v361_v20 = vld [vmem:[%s492_s5 + $0x18] sm:$0xff]  }
  0x16   :  { %317 = vmatprep.subr.bf16.mxu0 %v389_v0  ;;  %325 = vmatprep.subr.bf16.mxu1 %v389_v0  ;;  %v286_v11 = vld [vmem:[%s489_s2] ss:$0 sm:$0xff] }
  0x17   :  { %v290_v21 = vld [vmem:[%s491_s4] ss:$0 sm:$0xff] }
  0x18   :  { %v296_v29 = vld [vmem:[%s493_s6] ss:$0 sm:$0xff] }
  0x19   :  { %318 = vmatpush3.bf16.msra.mxu0 %v353_v2  ;;  %326 = vmatpush3.bf16.msra.mxu1 %v355_v5 }
  0x1a   :  { %335 = vmatprep.subr.bf16.mxu0 %v389_v0  ;;  %327 = vmatprep.subr.bf16.mxu1 %v389_v0 }
  0x1c   :  { %320 = vmatmul.mubr.msk.bf16.vlgmr.msra.gmra.mrb[0].mxu0 %vm66_vm1, %v42_v6 }
  0x1d   :  { %343 = vmatprep.mubr.msk.bf16.mxu0 %vm390_vm0, %v389_v0  ;;  %328 = vmatpush3.bf16.msra.mxu1 %v356_v7 }
  0x1e   :  { %329 = vmatprep.subr.bf16.mxu1 %v389_v0  ;;  %336 = vmatpush3.bf16.msra.mxu0 %v358_v9 }
  0x1f   :  { %337 = vmatprep.subr.bf16.mxu0 %v389_v0 }
  0x21   :  { %330 = vmatpush3.bf16.msra.mxu1 %v357_v8 }
  0x22   :  { %338 = vmatpush3.bf16.msra.mxu0 %v359_v10 }
  0x23   :  { %339 = vmatprep.subr.bf16.mxu0 %v389_v0 }
  0x26   :  { %340 = vmatpush3.bf16.msra.mxu0 %v360_v19 }
  0x27   :  { %341 = vmatprep.subr.bf16.mxu0 %v389_v0 }
  0x2a   :  { %342 = vmatpush3.bf16.msra.mxu0 %v361_v20 }
  0xef   :  { %v104_v12 = vpop.f32.mrb[0].mxu0 }
  0xf0   :  { %v105_v13 = vadd.f32 %v286_v11, %v104_v12  ;;  %v321_v14 = vpop.f32.mrb[1].mxu0 }
  0xf1   :  { %v107_v15 = vpop.f32.mrb[2].mxu0 }
  0xf2   :  { %v110_v16 = vmax.f32 %v105_v13, 0.0  ;;  %v322_v17 = vpop.f32.mrb[3].mxu0 }
  0xf4   :  { %v111_v18 = vpack.c.bf16 %v110_v16, %v110_v16 }
  0xf6   :  { %332 = vmatmul.mubr.msk.bf16.vlgmr.msra.gmra.mrb[0].mxu1 %vm151_vm2, %v111_v18 }
 0x1c9   :  { %v189_v22 = vpop.f32.mrb[0].mxu1 }
 0x1ca   :  { %v190_v23 = vadd.f32 %v290_v21, %v189_v22  ;;  %v333_v24 = vpop.f32.mrb[1].mxu1 }
 0x1cb   :  { %v192_v25 = vpop.f32.mrb[2].mxu1 }
 0x1cc   :  { %v195_v26 = vmax.f32 %v190_v23, 0.0  ;;  %v334_v27 = vpop.f32.mrb[3].mxu1 }
 0x1ce   :  { %v196_v28 = vpack.c.bf16 %v195_v26, %v195_v26 }
 0x1d0   :  { %344 = vmatmul.mubr.msk.bf16.vlgmr.msra.gmra.mrb[4].mxu0 %vm151_vm2, %v196_v28 }
 0x2a3   :  { %v273_v30 = vpop.f32.mrb[4].mxu0 }
 0x2a4   :  { %v274_v31 = vadd.f32 %v296_v29, %v273_v30  ;;  %v345_v32 = vpop.f32.mrb[5].mxu0 }
 0x2a5   :  { %v276_v33 = vpop.f32.mrb[6].mxu0 }
 0x2a6   :  { %280 = vst.msk [vmem:[%s494_s7] sm:$0xff] %vm279_vm3, %v274_v31  ;;  %v346_v34 = vpop.f32.mrb[7].mxu0 }
 0x2a7   :  { %285 = vsyncpa [#allocation3], 1 }

</bundles_post_ra>
